<compile_context>
chip_gen: v6e
topology: v6e:2x2x1
jax: 0.10.0
libtpu: 0.0.40
codegen_flags: <defaults>
</compile_context>

<pallas_src>
from math import sqrt
from typing import NamedTuple

import jax
import jax.numpy as jnp
from jax.experimental import pallas as pl
from jax.experimental.pallas import tpu as pltpu


# ----------------------------- small helpers --------------------------------

def _round_up(x, m):
    return ((x + m - 1) // m) * m


def _halve8(t):
    return max(8, (t // 2) // 8 * 8)


def _pick_row_tile(M, tm_max):
    """Pick a row tile (multiple of 8) minimizing padded rows, preferring large."""
    tm_max = max(8, (tm_max // 8) * 8)
    m8 = _round_up(M, 8)
    if m8 <= tm_max:
        return m8
    best_mp, best_t = None, None
    t = tm_max
    while t >= 8:
        mp = _round_up(M, t)
        if best_mp is None or mp < best_mp:
            best_mp, best_t = mp, t
        if t == 8:
            break
        t = _halve8(t)
    return best_t


def _usable_vmem_bytes():
    """Generation-aware usable VMEM (v7x: 64 MiB/TC, v5e/v6e: 128 MiB)."""
    try:
        cap = int(pltpu.get_tpu_info().vmem_capacity_bytes)
    except Exception:
        cap = 64 << 20  # conservative fallback (v7x per-TC VMEM)
    return (cap * 4) // 5  # ~51 MiB on v7x, ~102 MiB on v5e/v6e


# -------------------------------- kernels ------------------------------------

def ffn_resident_kernel(x_ref, w1_ref, b1_ref, w2_ref, b2_ref, o_ref):
    # x_ref: (tm, d_p) bf16; w1_ref: (d_p, h_p) bf16; w2_ref: (h_p, d_p) bf16
    # b1_ref: (1, h_p) f32;  b2_ref: (1, d_p) f32;    o_ref: (tm, d_p)
    h = jnp.dot(x_ref[...], w1_ref[...], preferred_element_type=jnp.float32)
    h = jnp.maximum(h + b1_ref[...], 0.0)
    # TODO(synk): nn.Dropout(p=self.dropout) — p=0.0 in the module, so identity.
    y = jnp.dot(h.astype(w2_ref.dtype), w2_ref[...],
                preferred_element_type=jnp.float32)
    o_ref[...] = (y + b2_ref[...]).astype(o_ref.dtype)


def ffn_chunked_f32out_kernel(x_ref, w1_ref, b1_ref, w2_ref, b2_ref, o_ref):
    # hidden chunked along grid axis 1; accumulate directly into the f32
    # output block (resident across k because its index_map ignores k).
    k = pl.program_id(1)
    h = jnp.dot(x_ref[...], w1_ref[...], preferred_element_type=jnp.float32)
    h = jnp.maximum(h + b1_ref[...], 0.0)
    contrib = jnp.dot(h.astype(w2_ref.dtype), w2_ref[...],
                      preferred_element_type=jnp.float32)

    @pl.when(k == 0)
    def _():
        o_ref[...] = contrib + b2_ref[...]

    @pl.when(k > 0)
    def _():
        o_ref[...] = o_ref[...] + contrib


def ffn_chunked_scratch_kernel(x_ref, w1_ref, b1_ref, w2_ref, b2_ref, o_ref,
                               acc_ref):
    # Low-precision output dtype: accumulate in an f32 VMEM scratch.
    k = pl.program_id(1)
    h = jnp.dot(x_ref[...], w1_ref[...], preferred_element_type=jnp.float32)
    h = jnp.maximum(h + b1_ref[...], 0.0)
    contrib = jnp.dot(h.astype(w2_ref.dtype), w2_ref[...],
                      preferred_element_type=jnp.float32)

    @pl.when(k == 0)
    def _():
        acc_ref[...] = contrib

    @pl.when(k > 0)
    def _():
        acc_ref[...] = acc_ref[...] + contrib

    @pl.when(k == pl.num_programs(1) - 1)
    def _():
        o_ref[...] = (acc_ref[...] + b2_ref[...]).astype(o_ref.dtype)


# ------------------------------ parameter prep -------------------------------

class FFNParams(NamedTuple):
    w1_p: jax.Array   # (d_p, h_p) compute dtype
    b1_p: jax.Array   # (1, h_p)   f32
    w2_p: jax.Array   # (h_p, d_p) compute dtype
    b2_p: jax.Array   # (1, d_p)   f32
    d: int
    hidden: int


def prepare_ffn_params(w1, b1, w2, b2, *, compute_dtype=jnp.bfloat16):
    """Pad + cast the weights ONCE (cache and reuse across calls).
    w1: (embed, hidden), w2: (hidden, embed) — pre-transposed vs. PyTorch."""
    d, hidden = w1.shape
    assert w2.shape == (hidden, d) and b1.shape == (hidden,) and b2.shape == (d,)
    d_p = _round_up(d, 128)
    h_p = _round_up(hidden, 128)
    # TODO(synk): on v6e/v7x, 256-alignment would fully fill the 2x256^2 MXU;
    # it is free whenever the 128-rounded dims already land on a 256 multiple.
    if (d_p, h_p) == (d, hidden) and w1.dtype == compute_dtype:
        w1_p, w2_p = w1, w2
    else:
        w1_p = jnp.zeros((d_p, h_p), compute_dtype).at[:d, :hidden].set(
            w1.astype(compute_dtype))
        w2_p = jnp.zeros((h_p, d_p), compute_dtype).at[:hidden, :d].set(
            w2.astype(compute_dtype))
    b1_p = jnp.zeros((1, h_p), jnp.float32).at[0, :hidden].set(
        b1.astype(jnp.float32))
    b2_p = jnp.zeros((1, d_p), jnp.float32).at[0, :d].set(b2.astype(jnp.float32))
    return FFNParams(w1_p, b1_p, w2_p, b2_p, d, hidden)


# --------------------------------- wrapper ------------------------------------

def feed_forward_transducer(x, params: FFNParams, *, tm=512, tk_hidden=512,
                            compute_dtype=jnp.bfloat16, force_chunked=False):
    """x: (n, b, embed_dim) -> (n, b, embed_dim) in x.dtype."""
    n, b, d = x.shape
    assert d == params.d
    w1_p, b1_p, w2_p, b2_p = params.w1_p, params.b1_p, params.w2_p, params.b2_p
    d_p, h_p = w1_p.shape
    out_dtype = x.dtype
    M = n * b
    bpe = jnp.dtype(compute_dtype).itemsize
    out_bpe = jnp.dtype(out_dtype).itemsize
    usable = _usable_vmem_bytes()

    # ---- choose row tile (minimize padded rows, prefer large) ----
    tm_eff = _pick_row_tile(M, tm)

    # ---- resident-weights feasibility (weights double-buffer-allocated) ----
    def resident_est(tm_e):
        return (2 * 2 * d_p * h_p * bpe            # W1 + W2, 2 buffers each
                + 2 * 8 * (h_p + d_p) * 4          # biases (sublane-padded f32)
                + 2 * tm_e * d_p * bpe              # x tile, double-buffered
                + 2 * tm_e * d_p * out_bpe          # out tile, double-buffered
                + tm_e * h_p * 4)                   # live f32 intermediate h

    use_resident = False
    if not force_chunked:
        t = tm_eff
        while True:
            if resident_est(t) <= usable:
                use_resident, tm_eff = True, t
                break
            if t == 8:
                break
            t = _halve8(t)

    flops = None  # filled per path

    if use_resident:
        M_p = _round_up(M, tm_eff)
        n_rows = M_p // tm_eff
        x2 = x.reshape(M, d)
        if M_p == M and d_p == d:
            x_p = x2.astype(compute_dtype)
        else:
            x_p = jnp.zeros((M_p, d_p), compute_dtype).at[:M, :d].set(
                x2.astype(compute_dtype))

        vmem_limit = int(min(usable, max(resident_est(tm_eff) + (4 << 20),
                                         32 << 20)))
        cost = pl.CostEstimate(
            flops=4 * M_p * d_p * h_p,
            transcendentals=0,
            bytes_accessed=int(x_p.size * bpe + (w1_p.size + w2_p.size) * bpe
                               + (b1_p.size + b2_p.size) * 4
                               + M_p * d_p * out_bpe),
        )
        out_p = pl.pallas_call(
            ffn_resident_kernel,
            out_shape=jax.ShapeDtypeStruct((M_p, d_p), out_dtype),
            grid_spec=pltpu.PrefetchScalarGridSpec(
                num_scalar_prefetch=0,
                grid=(n_rows,),
                in_specs=[
                    pl.BlockSpec((tm_eff, d_p), lambda i: (i, 0)),   # x rows
                    pl.BlockSpec((d_p, h_p), lambda i: (0, 0)),      # W1 resident
                    pl.BlockSpec((1, h_p), lambda i: (0, 0)),        # b1 resident
                    pl.BlockSpec((h_p, d_p), lambda i: (0, 0)),      # W2 resident
                    pl.BlockSpec((1, d_p), lambda i: (0, 0)),        # b2 resident
                ],
                out_specs=pl.BlockSpec((tm_eff, d_p), lambda i: (i, 0)),
            ),
            compiler_params=pltpu.CompilerParams(
                # TODO(synk): on v7x, shard the row axis across both TensorCores
                # (pltpu.CORE_PARALLEL / pl.core_map); weights then duplicate
                # per-core, so halve the residency budget accordingly.
                dimension_semantics=("parallel",),
                vmem_limit_bytes=vmem_limit,
            ),
            cost_estimate=cost,
        )(x_p, w1_p, b1_p, w2_p, b2_p)
    else:
        # ---- chunked fallback: split hidden along an "arbitrary" axis ----
        tk = 128
        start = min(tk_hidden, h_p)
        start = max(128, (start // 128) * 128)
        for cand in range(start, 127, -128):
            if h_p % cand == 0:
                tk = cand
                break
        n_k = h_p // tk

        scratch_needed = jnp.dtype(out_dtype) != jnp.dtype(jnp.float32)

        def chunked_est(tm_e, nbuf):
            return (2 * tm_e * d_p * bpe                 # x tile
                    + 2 * tm_e * d_p * out_bpe            # out tile
                    + nbuf * 2 * d_p * tk * bpe           # W1 + W2 chunks
                    + 2 * 8 * (tk + d_p) * 4              # biases
                    + tm_e * tk * 4                       # live intermediate h
                    + (tm_e * d_p * 4 if scratch_needed else 0))

        n_buf_w = 3 if n_k >= 3 else 2                    # extra weight buffer
        if chunked_est(tm_eff, n_buf_w) > usable:
            n_buf_w = 2
        while chunked_est(tm_eff, n_buf_w) > usable and tm_eff > 8:
            tm_eff = _halve8(tm_eff)

        M_p = _round_up(M, tm_eff)
        n_rows = M_p // tm_eff
        x2 = x.reshape(M, d)
        if M_p == M and d_p == d:
            x_p = x2.astype(compute_dtype)
        else:
            x_p = jnp.zeros((M_p, d_p), compute_dtype).at[:M, :d].set(
                x2.astype(compute_dtype))

        if n_buf_w > 2:
            w1_spec = pl.BlockSpec((d_p, tk), lambda i, k: (0, k),
                                   pipeline_mode=pl.Buffered(n_buf_w))
            w2_spec = pl.BlockSpec((tk, d_p), lambda i, k: (k, 0),
                                   pipeline_mode=pl.Buffered(n_buf_w))
        else:
            w1_spec = pl.BlockSpec((d_p, tk), lambda i, k: (0, k))
            w2_spec = pl.BlockSpec((tk, d_p), lambda i, k: (k, 0))

        if scratch_needed:
            kernel_fn = ffn_chunked_scratch_kernel
            scratch = [pltpu.VMEM((tm_eff, d_p), jnp.float32)]
        else:
            kernel_fn = ffn_chunked_f32out_kernel
            scratch = []

        vmem_limit = int(min(usable, max(chunked_est(tm_eff, n_buf_w) + (4 << 20),
                                         32 << 20)))
        cost = pl.CostEstimate(
            flops=4 * M_p * d_p * h_p,
            transcendentals=0,
            bytes_accessed=int(x_p.size * bpe
                               + n_rows * (w1_p.size + w2_p.size) * bpe
                               + (b1_p.size + b2_p.size) * 4
                               + M_p * d_p * out_bpe),
        )
        out_p = pl.pallas_call(
            kernel_fn,
            out_shape=jax.ShapeDtypeStruct((M_p, d_p), out_dtype),
            grid_spec=pltpu.PrefetchScalarGridSpec(
                num_scalar_prefetch=0,
                grid=(n_rows, n_k),
                in_specs=[
                    pl.BlockSpec((tm_eff, d_p), lambda i, k: (i, 0)),  # x rows
                    w1_spec,                                           # W1 chunk
                    pl.BlockSpec((1, tk), lambda i, k: (0, k)),        # b1 chunk
                    w2_spec,                                           # W2 chunk
                    pl.BlockSpec((1, d_p), lambda i, k: (0, 0)),       # b2
                ],
                out_specs=pl.BlockSpec((tm_eff, d_p), lambda i, k: (i, 0)),
                scratch_shapes=scratch,
            ),
            compiler_params=pltpu.CompilerParams(
                dimension_semantics=("parallel", "arbitrary"),
                vmem_limit_bytes=vmem_limit,
            ),
            cost_estimate=cost,
        )(x_p, w1_p, b1_p, w2_p, b2_p)

    # TODO(synk): optional fp8 weight path on v7x (2x MXU throughput, half the
    # weight footprint) — gated behind an accuracy check, so not enabled here.
    if (M_p, d_p) != (M, d):
        out_p = out_p[:M, :d]
    return out_p.reshape(n, b, d)


# --------------------------------- demo ---------------------------------------

def glorot_uniform(key, fan_in, fan_out):
    """nn.init.xavier_uniform_ (gain=1). Returned as (fan_in, fan_out), i.e.
    the transpose of the PyTorch nn.Linear weight layout."""
    limit = sqrt(6.0 / (fan_in + fan_out))
    return jax.random.uniform(key, (fan_in, fan_out), dtype=jnp.float32,
                              minval=-limit, maxval=limit)


if __name__ == "__main__":
    embed_dim, hidden_dim = 32, 64
    n, b = 8, 2

    root = jax.random.PRNGKey(0)
    kx, kw1, kw2 = jax.random.split(root, 3)

    x = jax.random.normal(kx, (n, b, embed_dim), dtype=jnp.float32)
    w1 = glorot_uniform(kw1, embed_dim, hidden_dim)       # (embed, hidden)
    b1 = jnp.zeros((hidden_dim,), jnp.float32)            # init.constant_(bias, 0)
    w2 = glorot_uniform(kw2, hidden_dim, embed_dim)       # (hidden, embed)
    b2 = jnp.zeros((embed_dim,), jnp.float32)

    # Weights padded + cast once (cache across calls).
    params = prepare_ffn_params(w1, b1, w2, b2)

    # Primary (resident-weights) path.
    out = jax.block_until_ready(feed_forward_transducer(x, params))
    ref = jnp.maximum(x @ w1 + b1, 0.0) @ w2 + b2
    assert out.shape == (n, b, embed_dim)
    assert jnp.allclose(out, ref, atol=5e-2, rtol=5e-2)

    # Also exercise the chunked fallback (hidden split across an "arbitrary"
    # grid axis) at small shapes, both output-dtype variants.
    hidden2 = 256
    kw3, kw4 = jax.random.split(jax.random.PRNGKey(1), 2)
    w1b = glorot_uniform(kw3, embed_dim, hidden2)
    b1b = jnp.zeros((hidden2,), jnp.float32)
    w2b = glorot_uniform(kw4, hidden2, embed_dim)
    b2b = jnp.zeros((embed_dim,), jnp.float32)
    params_b = prepare_ffn_params(w1b, b1b, w2b, b2b)
    refb = jnp.maximum(x @ w1b + b1b, 0.0) @ w2b + b2b

    # f32 output -> accumulate directly into the resident output block.
    out_b = jax.block_until_ready(
        feed_forward_transducer(x, params_b, tk_hidden=128, force_chunked=True))
    assert jnp.allclose(out_b, refb, atol=5e-2, rtol=5e-2)

    # bf16 output -> f32 VMEM scratch accumulator path.
    out_c = jax.block_until_ready(
        feed_forward_transducer(x.astype(jnp.bfloat16), params_b,
                                tk_hidden=128, force_chunked=True))
    assert jnp.allclose(out_c.astype(jnp.float32), refb, atol=1e-1, rtol=1e-1)

    print("KERNEL_OK")
</pallas_src>

<mosaic_0001>
module attributes {stable_mosaic.version = 11 : i64} {
  func.func @ffn_resident_kernel(%arg0: i32, %arg1: memref<16x128xbf16, #tpu.memory_space<vmem>>, %arg2: memref<128x128xbf16, #tpu.memory_space<vmem>>, %arg3: memref<1x128xf32, #tpu.memory_space<vmem>>, %arg4: memref<128x128xbf16, #tpu.memory_space<vmem>>, %arg5: memref<1x128xf32, #tpu.memory_space<vmem>>, %arg6: memref<16x128xf32, #tpu.memory_space<vmem>>) attributes {dimension_semantics = [#tpu.dimension_semantics<parallel>], iteration_bounds = array<i64: 1>, scalar_prefetch = 0 : i64, scratch_operands = 0 : i64, tpu.core_type = #tpu.core_type<tc>, window_params = [{transform_indices = @transform_0, window_bounds = array<i64: 16, 128>}, {pipeline_mode = #tpu.pipeline_mode<synchronous>, transform_indices = @transform_1, window_bounds = array<i64: 128, 128>}, {pipeline_mode = #tpu.pipeline_mode<synchronous>, transform_indices = @transform_2, window_bounds = array<i64: 1, 128>}, {pipeline_mode = #tpu.pipeline_mode<synchronous>, transform_indices = @transform_3, window_bounds = array<i64: 128, 128>}, {pipeline_mode = #tpu.pipeline_mode<synchronous>, transform_indices = @transform_4, window_bounds = array<i64: 1, 128>}, {transform_indices = @transform_5, window_bounds = array<i64: 16, 128>}]} {
    %c0 = arith.constant 0 : index
    %c0_0 = arith.constant 0 : index
    %0 = vector.load %arg1[%c0, %c0_0] : memref<16x128xbf16, #tpu.memory_space<vmem>>, vector<16x128xbf16>
    %c0_1 = arith.constant 0 : index
    %c0_2 = arith.constant 0 : index
    %1 = vector.load %arg2[%c0_1, %c0_2] : memref<128x128xbf16, #tpu.memory_space<vmem>>, vector<128x128xbf16>
    %cst = arith.constant dense<0.000000e+00> : vector<16x128xf32>
    %2 = tpu.matmul %0, %1, %cst {dimension_numbers = #tpu.dot_dimension_numbers<[1], [0], [0], [1], [0, 0, 1, 1], [], []>} : vector<16x128xbf16>, vector<128x128xbf16>, vector<16x128xf32> -> vector<16x128xf32>
    %c0_3 = arith.constant 0 : index
    %c0_4 = arith.constant 0 : index
    %3 = vector.load %arg3[%c0_3, %c0_4] : memref<1x128xf32, #tpu.memory_space<vmem>>, vector<1x128xf32>
    %4 = vector.broadcast %3 : vector<1x128xf32> to vector<16x128xf32>
    %5 = arith.addf %2, %4 : vector<16x128xf32>
    %cst_5 = arith.constant 0.000000e+00 : f32
    %6 = vector.broadcast %cst_5 : f32 to vector<16x128xf32>
    %7 = arith.maximumf %5, %6 : vector<16x128xf32>
    %8 = arith.truncf %7 : vector<16x128xf32> to vector<16x128xbf16>
    %c0_6 = arith.constant 0 : index
    %c0_7 = arith.constant 0 : index
    %9 = vector.load %arg4[%c0_6, %c0_7] : memref<128x128xbf16, #tpu.memory_space<vmem>>, vector<128x128xbf16>
    %cst_8 = arith.constant dense<0.000000e+00> : vector<16x128xf32>
    %10 = tpu.matmul %8, %9, %cst_8 {dimension_numbers = #tpu.dot_dimension_numbers<[1], [0], [0], [1], [0, 0, 1, 1], [], []>} : vector<16x128xbf16>, vector<128x128xbf16>, vector<16x128xf32> -> vector<16x128xf32>
    %c0_9 = arith.constant 0 : index
    %c0_10 = arith.constant 0 : index
    %11 = vector.load %arg5[%c0_9, %c0_10] : memref<1x128xf32, #tpu.memory_space<vmem>>, vector<1x128xf32>
    %12 = vector.broadcast %11 : vector<1x128xf32> to vector<16x128xf32>
    %13 = arith.addf %10, %12 : vector<16x128xf32>
    %c0_11 = arith.constant 0 : index
    %c0_12 = arith.constant 0 : index
    %14 = vector.load %arg6[%c0_11, %c0_12] : memref<16x128xf32, #tpu.memory_space<vmem>>, vector<16x128xf32>
    tpu.vector_store %arg6[%c0_11, %c0_12], %13 {strides = array<i32>} : memref<16x128xf32, #tpu.memory_space<vmem>>, vector<16x128xf32>,
    return
  }
  func.func @transform_0(%arg0: i32) -> (i32, i32) {
    %c0_i32 = arith.constant 0 : i32
    %c0_i32_0 = arith.constant 0 : i32
    return %arg0, %c0_i32 : i32, i32
  }
  func.func @transform_1(%arg0: i32) -> (i32, i32) {
    %c0_i32 = arith.constant 0 : i32
    %c0_i32_0 = arith.constant 0 : i32
    %c0_i32_1 = arith.constant 0 : i32
    return %c0_i32, %c0_i32_0 : i32, i32
  }
  func.func @transform_2(%arg0: i32) -> (i32, i32) {
    %c0_i32 = arith.constant 0 : i32
    %c0_i32_0 = arith.constant 0 : i32
    %c0_i32_1 = arith.constant 0 : i32
    return %c0_i32, %c0_i32_0 : i32, i32
  }
  func.func @transform_3(%arg0: i32) -> (i32, i32) {
    %c0_i32 = arith.constant 0 : i32
    %c0_i32_0 = arith.constant 0 : i32
    %c0_i32_1 = arith.constant 0 : i32
    return %c0_i32, %c0_i32_0 : i32, i32
  }
  func.func @transform_4(%arg0: i32) -> (i32, i32) {
    %c0_i32 = arith.constant 0 : i32
    %c0_i32_0 = arith.constant 0 : i32
    %c0_i32_1 = arith.constant 0 : i32
    return %c0_i32, %c0_i32_0 : i32, i32
  }
  func.func @transform_5(%arg0: i32) -> (i32, i32) {
    %c0_i32 = arith.constant 0 : i32
    %c0_i32_0 = arith.constant 0 : i32
    return %arg0, %c0_i32 : i32, i32
  }
}

</mosaic_0001>

<bundles_post_ra>
// kernel: tpu_custom_call.1
= control target key start
LH: loop header
LB: loop body
LE: loop exit
PB: predicated region body
PF: predicated region fallthrough
CT: control target
= control target key end

     0   :  { %10 = vsyncpa [#allocation3], 0  ;;  %s566_s0 = inlined_call_operand.hbm [shape: bf16[16,128], index: 0, kind: input, shape index: {}]   ;;  %s567_s1 = inlined_call_operand.hbm [shape: bf16[128,128], index: 1, kind: input, shape index: {}]   ;;  %s568_s2 = inlined_call_operand.vmem [shape: f32[1,128], index: 2, kind: input, shape index: {}]   ;;  %s569_s3 = inlined_call_operand.hbm [shape: bf16[128,128], index: 3, kind: input, shape index: {}]   ;;  %s570_s4 = inlined_call_operand.vmem [shape: f32[1,128], index: 4, kind: input, shape index: {}]   ;;  %s571_s5 = inlined_call_operand.hbm [shape: f32[16,128], index: 5, kind: output, shape index: {}]  }
   0x1   :  { %11 = vsyncpa [#allocation6], 0 }
   0x2   :  { %12 = vsyncpa [#allocation4], 0  ;;  %s508_s18 = smov [#allocation5]   ;;  %s509_s20 = smov [#allocation2]  }
   0x3   :  { %s30_s19 = sshll.u32 %s508_s18, 4  ;;  %s18_s21 = sshll.u32 %s509_s20, 4  ;;  %s31_s19 = int_to_ptr.vmem [resolvable:$true] %s30_s19  ;;  %s19_s21 = int_to_ptr.vmem [resolvable:$true] %s18_s21 }
   0x4   :  { %s430_s22 = scalar_lea.vmem %s31_s19, 1024  ;;  %p435_p1 = scmp.lt.s32.totalorder %s31_s19, %s31_s19 }
   0x5   :  { %p431_p0 = scmp.ne.s32.totalorder %s31_s19, %s430_s22  ;;  %p436_p2 = scmp.lt.s32.totalorder %s430_s22, %s430_s22 }
   0x7   :  { %p437_p3 = por %p436_p2, %p435_p1 }
   0x9   :  { %p438_p4 = pnand %p437_p3, %p431_p0 }
   0xb   :  { %441 = shalt.err (!%p438_p4)
}
   0xc   :  { %s510_s23 = smov 64   ;;  %s511_s24 = smov 4  }
   0xd   :  { %36 = dma.hbm_to_vmem [thread:$0]  %s567_s1, 1024, %s31_s19, [#allocation6], %s510_s23, %s510_s23, %s511_s24  }
   0xe   :  { %s450_s27 = scalar_lea.vmem %s19_s21, 128  ;;  %p455_p6 = scmp.lt.s32.totalorder %s19_s21, %s19_s21 }
   0xf   :  { %p451_p5 = scmp.ne.s32.totalorder %s19_s21, %s450_s27  ;;  %p456_p7 = scmp.lt.s32.totalorder %s450_s27, %s450_s27 }
  0x11   :  { %p457_p8 = por %p456_p7, %p455_p6 }
  0x13   :  { %p458_p9 = pnand %p457_p8, %p451_p5 }
  0x15   :  { %461 = shalt.err (!%p458_p9)
}
  0x16   :  { %24 = dma.hbm_to_vmem [thread:$0]  %s566_s0, 128, %s19_s21, [#allocation3], %s510_s23, %s510_s23, %s511_s24  }
  0x17   :  { %s512_s30 = smov [#allocation7]  }
  0x18   :  { %s44_s6 = sshll.u32 %s512_s30, 4  ;;  %s45_s6 = int_to_ptr.vmem [resolvable:$true] %s44_s6 }
  0x19   :  { %s470_s7 = scalar_lea.vmem %s45_s6, 1024  ;;  %p475_p11 = scmp.lt.s32.totalorder %s45_s6, %s45_s6 }
  0x1a   :  { %p471_p10 = scmp.ne.s32.totalorder %s45_s6, %s470_s7  ;;  %p476_p12 = scmp.lt.s32.totalorder %s470_s7, %s470_s7 }
  0x1c   :  { %p477_p13 = por %p476_p12, %p475_p11 }
  0x1e   :  { %p478_p0 = pnand %p477_p13, %p471_p10 }
  0x20   :  { %481 = shalt.err (!%p478_p0)
}
  0x21   :  { %50 = dma.hbm_to_vmem [thread:$0]  %s569_s3, 1024, %s45_s6, [#allocation6], %s510_s23, %s510_s23, %s511_s24  }
  0x22   :  { %502 = dma.done.wait [#allocation3], 128  }
  0x23   :  { %503 = vsyncadd [#allocation3], 4294967168 }
  0x24   :  { %504 = dma.done.wait [#allocation6], 2048  }
  0x25   :  { %505 = vsyncadd [#allocation6], 4294965248  ;;  %v513_v0 = vmov 0.0   ;;  %vm514_vm0 = vmmov 0   ;;  %v405_v1 = vld [vmem:[#allocation5 + $0x38] sm:$0xff]   ;;  %v406_v2 = vld [vmem:[#allocation5 + $0x30] sm:$0xff]  }
  0x26   :  { %355 = vmatprep.subr.bf16.mxu0 %v513_v0  ;;  %371 = vmatprep.mubr.msk.bf16.mxu0 %vm514_vm0, %v513_v0  ;;  %v407_v3 = vld [vmem:[#allocation5 + $0x28] sm:$0xff]   ;;  %v414_v4 = vld [vmem:[#allocation7 + $0x38] sm:$0xff]   ;;  %v408_v5 = vld [vmem:[#allocation5 + $0x20] sm:$0xff]   ;;  %s515_s11 = smov [#allocation8]  }
  0x27   :  { %375 = vmatprep.subr.bf16.mxu1 %v513_v0  ;;  %391 = vmatprep.mubr.msk.bf16.mxu1 %vm514_vm0, %v513_v0  ;;  %v415_v6 = vld [vmem:[#allocation7 + $0x30] sm:$0xff]   ;;  %v409_v7 = vld [vmem:[#allocation5 + $0x18] sm:$0xff]   ;;  %v416_v8 = vld [vmem:[#allocation7 + $0x28] sm:$0xff]   ;;  %s305_s12 = sshll.u32 %s515_s11, 4  ;;  %s306_s12 = int_to_ptr.vmem [resolvable:$true] %s305_s12 }
  0x28   :  { %356 = vmatpush3.bf16.msra.mxu0 %v405_v1  ;;  %376 = vmatpush3.bf16.msra.mxu1 %v414_v4  ;;  %v410_v9 = vld [vmem:[#allocation5 + $0x10] sm:$0xff]   ;;  %v417_v10 = vld [vmem:[#allocation7 + $0x20] sm:$0xff]   ;;  %v411_v11 = vld [vmem:[#allocation5 + $0x8] sm:$0xff]   ;;  %p487_p2 = scmp.lt.s32.totalorder %s306_s12, %s306_s12 }
  0x29   :  { %357 = vmatprep.subr.bf16.mxu0 %v513_v0  ;;  %377 = vmatprep.subr.bf16.mxu1 %v513_v0  ;;  %v418_v12 = vld [vmem:[#allocation7 + $0x18] sm:$0xff]   ;;  %v412_v13 = vld [vmem:[#allocation5] sm:$0xff]   ;;  %v419_v15 = vld [vmem:[#allocation7 + $0x10] sm:$0xff]  }
  0x2a   :  { %v413_v14 = vld [vmem:[#allocation2] sm:$0xff]   ;;  %v420_v16 = vld [vmem:[#allocation7 + $0x8] sm:$0xff]   ;;  %v421_v17 = vld [vmem:[#allocation7] sm:$0xff]  }
  0x2b   :  { %v318_v18 = vld [vmem:[%s568_s2] ss:$0 sm:$0xff]  ;;  %s482_s2 = scalar_lea.vmem %s306_s12, 256 }
  0x2c   :  { %358 = vmatpush3.bf16.msra.mxu0 %v406_v2  ;;  %378 = vmatpush3.bf16.msra.mxu1 %v415_v6  ;;  %v328_v28 = vld [vmem:[%s570_s4] ss:$0 sm:$0xff]  ;;  %p483_p1 = scmp.ne.s32.totalorder %s306_s12, %s482_s2  ;;  %p488_p3 = scmp.lt.s32.totalorder %s482_s2, %s482_s2 }
  0x2d   :  { %359 = vmatprep.subr.bf16.mxu0 %v513_v0  ;;  %379 = vmatprep.subr.bf16.mxu1 %v513_v0 }
  0x2e   :  { %p489_p4 = por %p488_p3, %p487_p2 }
  0x30   :  { %360 = vmatpush3.bf16.msra.mxu0 %v407_v3  ;;  %380 = vmatpush3.bf16.msra.mxu1 %v416_v8  ;;  %p490_p5 = pnand %p489_p4, %p483_p1 }
  0x31   :  { %361 = vmatprep.subr.bf16.mxu0 %v513_v0  ;;  %381 = vmatprep.subr.bf16.mxu1 %v513_v0 }
  0x34   :  { %362 = vmatpush3.bf16.msra.mxu0 %v408_v5  ;;  %382 = vmatpush3.bf16.msra.mxu1 %v417_v10 }
  0x35   :  { %363 = vmatprep.subr.bf16.mxu0 %v513_v0  ;;  %383 = vmatprep.subr.bf16.mxu1 %v513_v0 }
  0x38   :  { %364 = vmatpush3.bf16.msra.mxu0 %v409_v7  ;;  %384 = vmatpush3.bf16.msra.mxu1 %v418_v12 }
  0x39   :  { %365 = vmatprep.subr.bf16.mxu0 %v513_v0  ;;  %385 = vmatprep.subr.bf16.mxu1 %v513_v0 }
  0x3c   :  { %366 = vmatpush3.bf16.msra.mxu0 %v410_v9  ;;  %386 = vmatpush3.bf16.msra.mxu1 %v419_v15 }
  0x3d   :  { %367 = vmatprep.subr.bf16.mxu0 %v513_v0  ;;  %387 = vmatprep.subr.bf16.mxu1 %v513_v0 }
  0x40   :  { %368 = vmatpush3.bf16.msra.mxu0 %v411_v11  ;;  %388 = vmatpush3.bf16.msra.mxu1 %v420_v16 }
  0x41   :  { %369 = vmatprep.subr.bf16.mxu0 %v513_v0  ;;  %389 = vmatprep.subr.bf16.mxu1 %v513_v0 }
  0x44   :  { %370 = vmatpush3.bf16.msra.mxu0 %v412_v13  ;;  %390 = vmatpush3.bf16.msra.mxu1 %v421_v17 }
  0x47   :  { %372 = vmatmul.mubr.bf16.vlgmr.msra.gmra.mxu0 %v413_v14 }
 0x107   :  { %v176_v19 = vpop.f32.mrf.mxu0 }
 0x108   :  { %v177_v21 = vadd.f32 %v318_v18, %v176_v19 }
 0x109   :  { %v373_v20 = vpop.f32.mrf.mxu0 }
 0x10a   :  { %v183_v25 = vmax.f32 %v177_v21, 0.0 }
 0x10b   :  { %v179_v22 = vpop.f32.mrf.mxu0 }
 0x10c   :  { %v180_v23 = vadd.f32 %v318_v18, %v179_v22 }
 0x10d   :  { %v374_v24 = vpop.f32.mrf.mxu0 }
 0x10e   :  { %v184_v26 = vmax.f32 %v180_v23, 0.0 }
 0x110   :  { %v185_v27 = vpack.c.bf16 %v184_v26, %v183_v25 }
 0x112   :  { %392 = vmatmul.mubr.bf16.vlgmr.msra.gmra.mxu1 %v185_v27 }
 0x1d2   :  { %v291_v29 = vpop.f32.mrf.mxu1 }
 0x1d3   :  { %v292_v30 = vadd.f32 %v328_v28, %v291_v29 }
 0x1d4   :  { %v393_v31 = vpop.f32.mrf.mxu1 }
 0x1d5   :  { %298 = vst [vmem:[#allocation8] sm:$0xff] %v292_v30 }
 0x1d6   :  { %v294_v32 = vpop.f32.mrf.mxu1 }
 0x1d7   :  { %v295_v33 = vadd.f32 %v328_v28, %v294_v32 }
 0x1d8   :  { %v394_v34 = vpop.f32.mrf.mxu1 }
 0x1d9   :  { %299 = vst [vmem:[#allocation8 + $0x8] sm:$0xff] %v295_v33 }
 0x1da   :  { %493 = shalt.err (!%p490_p5)
}
 0x1db   :  { %s516_s13 = smov 128   ;;  %s517_s4 = smov 8  }
 0x1dc   :  { %311 = dma.vmem_to_hbm [thread:$0]  %s306_s12, 256, %s571_s5, [#allocation4], %s516_s13, %s516_s13, %s517_s4  }
 0x1dd   :  { %506 = dma.done.wait [#allocation4], 256  }
 0x1de   :  { %507 = vsyncadd [#allocation4], 4294967040 }
 0x1df   :  { %315 = vsyncpa [#allocation3], 1 }
 0x1e0   :  { %316 = vsyncpa [#allocation6], 1 }
 0x1e1   :  { %317 = vsyncpa [#allocation4], 1 }

</bundles_post_ra>
